<compile_context>
chip_gen: v7x
topology: tpu7x:2x2x1
jax: 0.10.0
libtpu: 0.0.40
codegen_flags: <defaults>
</compile_context>

<pallas_src>
import jax
import jax.numpy as jnp
from jax.experimental import pallas as pl
from jax.experimental.pallas import tpu as pltpu


LANE = 128             # rows per lane group (f32 lane width)
TILE_R = 2048           # target rows (lanes) per grid step; multiple of 128
SPLIT_THRESHOLD = 1024  # rows above which we force >= 2 grid steps (v7x dual-TC)


def _round_up(x, m):
    return (x + m - 1) // m * m


def _cdiv(a, b):
    return (a + b - 1) // b


# -----------------------------------------------------------------------------
# Kernel bodies (feature-major: features on sublanes, rows on lanes).
# -----------------------------------------------------------------------------
def _head(obsT, bias1, wrepT, brep, w1sT, w2T, b2, w3T, b3):
    # representation: state = ReLU(Wrep^T @ obs^T + brep)        -> (state_dim, tr)
    state = jnp.maximum(
        jnp.dot(wrepT, obsT, preferred_element_type=jnp.float32) + brep, 0.0)
    # Q-head layer 1 on concat([state, ids]): W1s^T @ state + (W1a^T @ ids^T + b1)
    h = jnp.maximum(
        jnp.dot(w1sT, state, preferred_element_type=jnp.float32) + bias1, 0.0)
    # Q-head layer 2
    h = jnp.maximum(
        jnp.dot(w2T, h, preferred_element_type=jnp.float32) + b2, 0.0)
    # final linear (no activation) -> evalQ^T
    return jnp.dot(w3T, h, preferred_element_type=jnp.float32) + b3


def mixing_qnet_kernel_folded(obsT_ref, b1col_ref, wrepT_ref, brep_ref, w1sT_ref,
                              w2T_ref, b2_ref, w3T_ref, b3_ref, qT_ref):
    # Fast path: agent-id contribution pre-folded into a resident per-column bias.
    qT_ref[...] = _head(obsT_ref[...], b1col_ref[...], wrepT_ref[...], brep_ref[...],
                        w1sT_ref[...], w2T_ref[...], b2_ref[...], w3T_ref[...],
                        b3_ref[...])


def mixing_qnet_kernel_general(obsT_ref, idsT_ref, wrepT_ref, brep_ref, w1sT_ref,
                               w1aT_ref, b1_ref, w2T_ref, b2_ref, w3T_ref, b3_ref,
                               qT_ref):
    # General path: stream ids^T (N rows only) and do the tiny K=N dot in-kernel.
    bias1 = jnp.dot(w1aT_ref[...], idsT_ref[...],
                    preferred_element_type=jnp.float32) + b1_ref[...]
    qT_ref[...] = _head(obsT_ref[...], bias1, wrepT_ref[...], brep_ref[...],
                        w1sT_ref[...], w2T_ref[...], b2_ref[...], w3T_ref[...],
                        b3_ref[...])


# -----------------------------------------------------------------------------
# Wrapper: layout plumbing (transpose/pad), tiling, pallas_call, argmax.
# -----------------------------------------------------------------------------
def mixing_qnetwork_forward(observation, agent_ids, params, *,
                            agent_ids_is_onehot_eye=False,
                            tile_r=TILE_R, use_bf16=False):
    """observation: (B, N, obs_dim) f32; agent_ids: (B, N, N) f32.

    `agent_ids_is_onehot_eye` is a STATIC flag: set True when agent_ids is the
    canonical broadcast identity (the usual case) to skip the ids HBM stream.
    """
    B, N, obs_dim = observation.shape
    state_dim = params["wrep"].shape[1]
    h1 = params["w1s"].shape[1]
    h2 = params["w2"].shape[1]
    n_actions = params["w3"].shape[1]
    R = B * N

    # ---- balanced row (lane) tiling -----------------------------------------
    R128 = _round_up(max(R, 1), LANE)
    num_tiles = _cdiv(R128, tile_r)
    if num_tiles == 1 and R128 >= SPLIT_THRESHOLD:
        num_tiles = 2                      # let v7x's two TCs split the work
    tr = _round_up(_cdiv(R128, num_tiles), LANE)
    R_pad = tr * num_tiles
    grid = (num_tiles,)

    mm_dtype = jnp.bfloat16 if use_bf16 else jnp.float32

    # obs streamed feature-major: (obs_dim, R_pad)
    obsT = observation.reshape(R, obs_dim).astype(jnp.float32).T
    if R_pad != R:
        obsT = jnp.pad(obsT, ((0, 0), (0, R_pad - R)))
    obsT = obsT.astype(mm_dtype)

    # Resident transposed weights / f32 column biases.
    wrepT = params["wrep"].T.astype(mm_dtype)               # (state_dim, obs_dim)
    w1sT = params["w1s"].T.astype(mm_dtype)                 # (h1, state_dim)
    w2T = params["w2"].T.astype(mm_dtype)                   # (h2, h1)
    w3T = params["w3"].T.astype(mm_dtype)                   # (n_actions, h2)
    brep = params["brep"].reshape(state_dim, 1).astype(jnp.float32)
    b2 = params["b2"].reshape(h2, 1).astype(jnp.float32)
    b3 = params["b3"].reshape(n_actions, 1).astype(jnp.float32)

    def const_spec(arr):  # full-extent block, resident across all grid steps
        nd = arr.ndim
        return pl.BlockSpec(arr.shape, lambda i, _nd=nd: (0,) * _nd)

    fast = agent_ids_is_onehot_eye and (tr % N == 0)
    if fast:
        # Rows are agent-major (r % N = agent), tr % N == 0 -> the per-column bias
        # repeats every N columns: one resident (h1, tr) table, zero per-step bytes.
        b1col = jnp.tile((params["w1a"] + params["b1"]).T.astype(jnp.float32),
                         (1, tr // N))                       # (h1, tr)
        kernel = mixing_qnet_kernel_folded
        inputs = (obsT, b1col, wrepT, brep, w1sT, w2T, b2, w3T, b3)
        in_specs = [
            pl.BlockSpec((obs_dim, tr), lambda i: (0, i)),   # obs: lane-tiled stream
            pl.BlockSpec((h1, tr), lambda i: (0, 0)),        # folded ids bias, resident
            const_spec(wrepT), const_spec(brep), const_spec(w1sT),
            const_spec(w2T), const_spec(b2), const_spec(w3T), const_spec(b3),
        ]
    else:
        idsT = agent_ids.reshape(R, N).astype(jnp.float32).T  # (N, R)
        if R_pad != R:
            idsT = jnp.pad(idsT, ((0, 0), (0, R_pad - R)))
        idsT = idsT.astype(mm_dtype)
        w1aT = params["w1a"].T.astype(mm_dtype)              # (h1, N)
        b1 = params["b1"].reshape(h1, 1).astype(jnp.float32)
        kernel = mixing_qnet_kernel_general
        inputs = (obsT, idsT, wrepT, brep, w1sT, w1aT, b1, w2T, b2, w3T, b3)
        in_specs = [
            pl.BlockSpec((obs_dim, tr), lambda i: (0, i)),   # obs stream
            pl.BlockSpec((N, tr), lambda i: (0, i)),         # ids stream (N rows only)
            const_spec(wrepT), const_spec(brep), const_spec(w1sT),
            const_spec(w1aT), const_spec(b1),
            const_spec(w2T), const_spec(b2), const_spec(w3T), const_spec(b3),
        ]

    qT_pad = pl.pallas_call(
        kernel,
        out_shape=jax.ShapeDtypeStruct((n_actions, R_pad), jnp.float32),
        grid=grid,
        in_specs=in_specs,
        out_specs=pl.BlockSpec((n_actions, tr), lambda i: (0, i)),  # lane-dense store
        compiler_params=pltpu.CompilerParams(
            dimension_semantics=("parallel",)),              # dual-TC on v7x
    )(*inputs)

    evalQ = qT_pad[:, :R].T.reshape(B, N, n_actions)
    argmax_action = jnp.argmax(evalQ, axis=-1)   # done in XLA; avoids a lane-sparse
    rnn_hidden = None                            # (R,1) masked-store output stream
    # TODO(synk): use_rnn=True branch would return (rnn_hidden, rnn_cell) here.
    return rnn_hidden, argmax_action, evalQ


# -----------------------------------------------------------------------------
# Deterministic synthetic parameters (weights ~ N(0, 0.1), biases 0 — matching
# `initialize(weight)` + `nn.init.constant_(bias, 0)` in mlp_block).
# -----------------------------------------------------------------------------
def make_params(obs_dim, state_dim, n_agents, hidden_sizes, n_actions, key):
    h1, h2 = hidden_sizes
    ks = jax.random.split(key, 5)
    scale = 0.1
    return {
        "wrep": jax.random.normal(ks[0], (obs_dim, state_dim), jnp.float32) * scale,
        "brep": jnp.zeros((1, state_dim), jnp.float32),
        # first Q-head layer acts on concat([state, agent_ids]) -> block-split weight
        "w1s": jax.random.normal(ks[1], (state_dim, h1), jnp.float32) * scale,
        "w1a": jax.random.normal(ks[2], (n_agents, h1), jnp.float32) * scale,
        "b1": jnp.zeros((1, h1), jnp.float32),
        "w2": jax.random.normal(ks[3], (h1, h2), jnp.float32) * scale,
        "b2": jnp.zeros((1, h2), jnp.float32),
        "w3": jax.random.normal(ks[4], (h2, n_actions), jnp.float32) * scale,
        "b3": jnp.zeros((1, n_actions), jnp.float32),
    }


def _reference_forward(observation, agent_ids, params):
    B, N, obs_dim = observation.shape
    obs2 = observation.reshape(-1, obs_dim)
    ids2 = agent_ids.reshape(-1, N)
    st = jnp.maximum(obs2 @ params["wrep"] + params["brep"], 0.0)
    h = jnp.maximum(st @ params["w1s"] + ids2 @ params["w1a"] + params["b1"], 0.0)
    h = jnp.maximum(h @ params["w2"] + params["b2"], 0.0)
    q = (h @ params["w3"] + params["b3"]).reshape(B, N, -1)
    return q


if __name__ == "__main__":
    key = jax.random.PRNGKey(0)
    k_obs, k_par, k_obs2, k_ids3 = jax.random.split(key, 4)

    # Small shapes consistent with the module's forward.
    batch, n_agents, obs_dim = 2, 4, 16
    state_dim, hidden_sizes, n_actions = 32, (32, 32), 8

    params = make_params(obs_dim, state_dim, n_agents, hidden_sizes, n_actions, k_par)

    # --- test 1: tiny batch, one-hot eye agent_ids -> fast (folded-bias) path ----
    observation = jax.random.normal(k_obs, (batch, n_agents, obs_dim), jnp.float32)
    agent_ids = jnp.broadcast_to(jnp.eye(n_agents, dtype=jnp.float32),
                                 (batch, n_agents, n_agents))

    rnn_hidden, argmax_action, evalQ = mixing_qnetwork_forward(
        observation, agent_ids, params, agent_ids_is_onehot_eye=True)
    jax.block_until_ready((argmax_action, evalQ))

    assert rnn_hidden is None
    assert evalQ.shape == (batch, n_agents, n_actions)
    assert argmax_action.shape == (batch, n_agents)

    q_ref = _reference_forward(observation, agent_ids, params)
    assert jnp.allclose(evalQ, q_ref, atol=1e-5)
    assert jnp.array_equal(argmax_action, jnp.argmax(q_ref, axis=-1))

    # --- test 2: larger batch -> multi-step grid (>=2 tiles) + row padding -------
    batch2 = 300                                  # R = 1200 -> 2 tiles of 640, 80 pad
    observation2 = jax.random.normal(k_obs2, (batch2, n_agents, obs_dim), jnp.float32)
    agent_ids2 = jnp.broadcast_to(jnp.eye(n_agents, dtype=jnp.float32),
                                  (batch2, n_agents, n_agents))
    _, argmax2, evalQ2 = mixing_qnetwork_forward(
        observation2, agent_ids2, params, agent_ids_is_onehot_eye=True)
    jax.block_until_ready((argmax2, evalQ2))

    q_ref2 = _reference_forward(observation2, agent_ids2, params)
    assert jnp.allclose(evalQ2, q_ref2, atol=1e-5)
    assert jnp.array_equal(argmax2, jnp.argmax(q_ref2, axis=-1))

    # --- test 3: arbitrary (non-eye) agent_ids -> general streamed-ids path ------
    agent_ids3 = jax.random.normal(k_ids3, (batch, n_agents, n_agents), jnp.float32)
    _, argmax3, evalQ3 = mixing_qnetwork_forward(
        observation, agent_ids3, params, agent_ids_is_onehot_eye=False)
    jax.block_until_ready((argmax3, evalQ3))

    q_ref3 = _reference_forward(observation, agent_ids3, params)
    assert jnp.allclose(evalQ3, q_ref3, atol=1e-5)
    assert jnp.array_equal(argmax3, jnp.argmax(q_ref3, axis=-1))

    print("KERNEL_OK")
</pallas_src>

<mosaic_0001>
module attributes {stable_mosaic.version = 11 : i64} {
  func.func @mixing_qnet_kernel_folded(%arg0: i32, %arg1: memref<16x128xf32, #tpu.memory_space<vmem>>, %arg2: memref<32x128xf32, #tpu.memory_space<vmem>>, %arg3: memref<32x16xf32, #tpu.memory_space<vmem>>, %arg4: memref<32x1xf32, #tpu.memory_space<vmem>>, %arg5: memref<32x32xf32, #tpu.memory_space<vmem>>, %arg6: memref<32x32xf32, #tpu.memory_space<vmem>>, %arg7: memref<32x1xf32, #tpu.memory_space<vmem>>, %arg8: memref<8x32xf32, #tpu.memory_space<vmem>>, %arg9: memref<8x1xf32, #tpu.memory_space<vmem>>, %arg10: memref<8x128xf32, #tpu.memory_space<vmem>>) attributes {dimension_semantics = [#tpu.dimension_semantics<parallel>], iteration_bounds = array<i64: 1>, scalar_prefetch = 0 : i64, scratch_operands = 0 : i64, tpu.core_type = #tpu.core_type<tc>, window_params = [{transform_indices = @transform_0, window_bounds = array<i64: 16, 128>}, {pipeline_mode = #tpu.pipeline_mode<synchronous>, transform_indices = @transform_1, window_bounds = array<i64: 32, 128>}, {pipeline_mode = #tpu.pipeline_mode<synchronous>, transform_indices = @transform_2, window_bounds = array<i64: 32, 16>}, {pipeline_mode = #tpu.pipeline_mode<synchronous>, transform_indices = @transform_3, window_bounds = array<i64: 32, 1>}, {pipeline_mode = #tpu.pipeline_mode<synchronous>, transform_indices = @transform_4, window_bounds = array<i64: 32, 32>}, {pipeline_mode = #tpu.pipeline_mode<synchronous>, transform_indices = @transform_5, window_bounds = array<i64: 32, 32>}, {pipeline_mode = #tpu.pipeline_mode<synchronous>, transform_indices = @transform_6, window_bounds = array<i64: 32, 1>}, {pipeline_mode = #tpu.pipeline_mode<synchronous>, transform_indices = @transform_7, window_bounds = array<i64: 8, 32>}, {pipeline_mode = #tpu.pipeline_mode<synchronous>, transform_indices = @transform_8, window_bounds = array<i64: 8, 1>}, {transform_indices = @transform_9, window_bounds = array<i64: 8, 128>}]} {
    %c0 = arith.constant 0 : index
    %c0_0 = arith.constant 0 : index
    %0 = vector.load %arg1[%c0, %c0_0] : memref<16x128xf32, #tpu.memory_space<vmem>>, vector<16x128xf32>
    %c0_1 = arith.constant 0 : index
    %c0_2 = arith.constant 0 : index
    %1 = vector.load %arg2[%c0_1, %c0_2] : memref<32x128xf32, #tpu.memory_space<vmem>>, vector<32x128xf32>
    %c0_3 = arith.constant 0 : index
    %c0_4 = arith.constant 0 : index
    %2 = vector.load %arg3[%c0_3, %c0_4] : memref<32x16xf32, #tpu.memory_space<vmem>>, vector<32x16xf32>
    %c0_5 = arith.constant 0 : index
    %c0_6 = arith.constant 0 : index
    %3 = vector.load %arg4[%c0_5, %c0_6] : memref<32x1xf32, #tpu.memory_space<vmem>>, vector<32x1xf32>
    %c0_7 = arith.constant 0 : index
    %c0_8 = arith.constant 0 : index
    %4 = vector.load %arg5[%c0_7, %c0_8] : memref<32x32xf32, #tpu.memory_space<vmem>>, vector<32x32xf32>
    %c0_9 = arith.constant 0 : index
    %c0_10 = arith.constant 0 : index
    %5 = vector.load %arg6[%c0_9, %c0_10] : memref<32x32xf32, #tpu.memory_space<vmem>>, vector<32x32xf32>
    %c0_11 = arith.constant 0 : index
    %c0_12 = arith.constant 0 : index
    %6 = vector.load %arg7[%c0_11, %c0_12] : memref<32x1xf32, #tpu.memory_space<vmem>>, vector<32x1xf32>
    %c0_13 = arith.constant 0 : index
    %c0_14 = arith.constant 0 : index
    %7 = vector.load %arg8[%c0_13, %c0_14] : memref<8x32xf32, #tpu.memory_space<vmem>>, vector<8x32xf32>
    %c0_15 = arith.constant 0 : index
    %c0_16 = arith.constant 0 : index
    %8 = vector.load %arg9[%c0_15, %c0_16] : memref<8x1xf32, #tpu.memory_space<vmem>>, vector<8x1xf32>
    %cst = arith.constant dense<0.000000e+00> : vector<32x128xf32>
    %9 = tpu.matmul %2, %0, %cst {dimension_numbers = #tpu.dot_dimension_numbers<[1], [0], [0], [1], [0, 0, 1, 1], [], []>} : vector<32x16xf32>, vector<16x128xf32>, vector<32x128xf32> -> vector<32x128xf32>
    %10 = vector.broadcast %3 : vector<32x1xf32> to vector<32x128xf32>
    %11 = arith.addf %9, %10 : vector<32x128xf32>
    %cst_17 = arith.constant 0.000000e+00 : f32
    %12 = vector.broadcast %cst_17 : f32 to vector<32x128xf32>
    %13 = arith.maximumf %11, %12 : vector<32x128xf32>
    %cst_18 = arith.constant dense<0.000000e+00> : vector<32x128xf32>
    %14 = tpu.matmul %4, %13, %cst_18 {dimension_numbers = #tpu.dot_dimension_numbers<[1], [0], [0], [1], [0, 0, 1, 1], [], []>} : vector<32x32xf32>, vector<32x128xf32>, vector<32x128xf32> -> vector<32x128xf32>
    %15 = arith.addf %14, %1 : vector<32x128xf32>
    %cst_19 = arith.constant 0.000000e+00 : f32
    %16 = vector.broadcast %cst_19 : f32 to vector<32x128xf32>
    %17 = arith.maximumf %15, %16 : vector<32x128xf32>
    %cst_20 = arith.constant dense<0.000000e+00> : vector<32x128xf32>
    %18 = tpu.matmul %5, %17, %cst_20 {dimension_numbers = #tpu.dot_dimension_numbers<[1], [0], [0], [1], [0, 0, 1, 1], [], []>} : vector<32x32xf32>, vector<32x128xf32>, vector<32x128xf32> -> vector<32x128xf32>
    %19 = vector.broadcast %6 : vector<32x1xf32> to vector<32x128xf32>
    %20 = arith.addf %18, %19 : vector<32x128xf32>
    %cst_21 = arith.constant 0.000000e+00 : f32
    %21 = vector.broadcast %cst_21 : f32 to vector<32x128xf32>
    %22 = arith.maximumf %20, %21 : vector<32x128xf32>
    %cst_22 = arith.constant dense<0.000000e+00> : vector<8x128xf32>
    %23 = tpu.matmul %7, %22, %cst_22 {dimension_numbers = #tpu.dot_dimension_numbers<[1], [0], [0], [1], [0, 0, 1, 1], [], []>} : vector<8x32xf32>, vector<32x128xf32>, vector<8x128xf32> -> vector<8x128xf32>
    %24 = vector.broadcast %8 : vector<8x1xf32> to vector<8x128xf32>
    %25 = arith.addf %23, %24 : vector<8x128xf32>
    %c0_23 = arith.constant 0 : index
    %c0_24 = arith.constant 0 : index
    %26 = vector.load %arg10[%c0_23, %c0_24] : memref<8x128xf32, #tpu.memory_space<vmem>>, vector<8x128xf32>
    tpu.vector_store %arg10[%c0_23, %c0_24], %25 {strides = array<i32>} : memref<8x128xf32, #tpu.memory_space<vmem>>, vector<8x128xf32>,
    return
  }
  func.func @transform_0(%arg0: i32) -> (i32, i32) {
    %c0_i32 = arith.constant 0 : i32
    %c0_i32_0 = arith.constant 0 : i32
    return %c0_i32, %arg0 : i32, i32
  }
  func.func @transform_1(%arg0: i32) -> (i32, i32) {
    %c0_i32 = arith.constant 0 : i32
    %c0_i32_0 = arith.constant 0 : i32
    %c0_i32_1 = arith.constant 0 : i32
    return %c0_i32, %c0_i32_0 : i32, i32
  }
  func.func @transform_2(%arg0: i32) -> (i32, i32) {
    %c0_i32 = arith.constant 0 : i32
    %c0_i32_0 = arith.constant 0 : i32
    %c0_i32_1 = arith.constant 0 : i32
    return %c0_i32, %c0_i32_0 : i32, i32
  }
  func.func @transform_3(%arg0: i32) -> (i32, i32) {
    %c0_i32 = arith.constant 0 : i32
    %c0_i32_0 = arith.constant 0 : i32
    %c0_i32_1 = arith.constant 0 : i32
    return %c0_i32, %c0_i32_0 : i32, i32
  }
  func.func @transform_4(%arg0: i32) -> (i32, i32) {
    %c0_i32 = arith.constant 0 : i32
    %c0_i32_0 = arith.constant 0 : i32
    %c0_i32_1 = arith.constant 0 : i32
    return %c0_i32, %c0_i32_0 : i32, i32
  }
  func.func @transform_5(%arg0: i32) -> (i32, i32) {
    %c0_i32 = arith.constant 0 : i32
    %c0_i32_0 = arith.constant 0 : i32
    %c0_i32_1 = arith.constant 0 : i32
    return %c0_i32, %c0_i32_0 : i32, i32
  }
  func.func @transform_6(%arg0: i32) -> (i32, i32) {
    %c0_i32 = arith.constant 0 : i32
    %c0_i32_0 = arith.constant 0 : i32
    %c0_i32_1 = arith.constant 0 : i32
    return %c0_i32, %c0_i32_0 : i32, i32
  }
  func.func @transform_7(%arg0: i32) -> (i32, i32) {
    %c0_i32 = arith.constant 0 : i32
    %c0_i32_0 = arith.constant 0 : i32
    %c0_i32_1 = arith.constant 0 : i32
    return %c0_i32, %c0_i32_0 : i32, i32
  }
  func.func @transform_8(%arg0: i32) -> (i32, i32) {
    %c0_i32 = arith.constant 0 : i32
    %c0_i32_0 = arith.constant 0 : i32
    %c0_i32_1 = arith.constant 0 : i32
    return %c0_i32, %c0_i32_0 : i32, i32
  }
  func.func @transform_9(%arg0: i32) -> (i32, i32) {
    %c0_i32 = arith.constant 0 : i32
    %c0_i32_0 = arith.constant 0 : i32
    return %c0_i32, %arg0 : i32, i32
  }
}

</mosaic_0001>

<bundles_post_ra>
// kernel: tpu_custom_call.1
= control target key start
LH: loop header
LB: loop body
LE: loop exit
PB: predicated region body
PF: predicated region fallthrough
CT: control target
= control target key end

     0   :  { %vm81_vm0 = vcmask 130048   ;;  %v645_v4 = vmov 0   ;;  %s809_s0 = inlined_call_operand.vmem [shape: f32[16,128], index: 0, kind: input, shape index: {}]   ;;  %s810_s1 = inlined_call_operand.vmem [shape: f32[32,128], index: 1, kind: input, shape index: {}]   ;;  %s811_s2 = inlined_call_operand.vmem [shape: f32[32,16], index: 2, kind: input, shape index: {}]   ;;  %s812_s3 = inlined_call_operand.vmem [shape: f32[32,1], index: 3, kind: input, shape index: {}]   ;;  %s813_s4 = inlined_call_operand.vmem [shape: f32[32,32], index: 4, kind: input, shape index: {}]   ;;  %s814_s5 = inlined_call_operand.vmem [shape: f32[32,32], index: 5, kind: input, shape index: {}]   ;;  %s815_s6 = inlined_call_operand.vmem [shape: f32[32,1], index: 6, kind: input, shape index: {}]   ;;  %s816_s7 = inlined_call_operand.vmem [shape: f32[8,32], index: 7, kind: input, shape index: {}]   ;;  %s817_s8 = inlined_call_operand.vmem [shape: f32[8,1], index: 8, kind: input, shape index: {}]   ;;  %s818_s9 = inlined_call_operand.hbm [shape: f32[8,128], index: 9, kind: output, shape index: {}]  }
   0x1   :  { %v33_v0 = vld [vmem:[%s809_s0] sm:$0xff]  ;;  %v34_v1 = vld [vmem:[%s809_s0 + $0x8] sm:$0xff]  ;;  %619 = vset.pattern.permute.xlu0 %v645_v4  ;;  %620 = vset.pattern.permute.xlu1 %v645_v4  ;;  %v45_v6 = vld [vmem:[%s812_s3 + $0x10] sm:$0xff] }
   0x2   :  { %v39_v2 = vld [vmem:[%s811_s2] sm:$0xff]  ;;  %v588_v3 = vpack.c.bf16 %v34_v1, %v33_v0  ;;  %v40_v7 = vld [vmem:[%s811_s2 + $0x8] sm:$0xff]  ;;  %73 = vperm.xlu1 %620, %v45_v6   ;;  %v41_v9 = vld [vmem:[%s811_s2 + $0x10] sm:$0xff] }
   0x3   :  { %543 = vmatprep.mubr.msk.f32.mxu0 %vm81_vm0, %v39_v2  ;;  %v43_v5 = vld [vmem:[%s812_s3] sm:$0xff]  ;;  %v44_v8 = vld [vmem:[%s812_s3 + $0x8] sm:$0xff]  ;;  %v46_v10 = vld [vmem:[%s812_s3 + $0x18] sm:$0xff] }
   0x4   :  { %589 = vmatprep.subr.bf16.mxu0 %v588_v3  ;;  %63 = vperm.xlu0 %619, %v43_v5  }
   0x5   :  { %591 = vmatpush3.bf16.msra.mxu0 %v588_v3 }
   0x6   :  { %14 = vsyncpa [#allocation3], 0  ;;  %v42_v11 = vld [vmem:[%s811_s2 + $0x18] sm:$0xff]  ;;  %v55_v12 = vld [vmem:[%s815_s6] sm:$0xff]  ;;  %78 = vperm.xlu1 %620, %v46_v10   ;;  %vm183_vm1 = vcmask 261120   ;;  %v646_v61 = vmov 0.0|0.0  }
   0x7   :  { %v56_v13 = vld [vmem:[%s815_s6 + $0x8] sm:$0xff]  ;;  %v57_v14 = vld [vmem:[%s815_s6 + $0x10] sm:$0xff]  ;;  %v58_v15 = vld [vmem:[%s815_s6 + $0x18] sm:$0xff]  ;;  %vm647_vm2 = vmmov 0   ;;  %v648_v62 = vmov 0.0   ;;  %s649_s13 = smov [#allocation2]  }
   0x8   :  { %544 = vmatmul.mubr.msk.f32.vlgmr.msra.gmra.mrb[0].mxu0 %vm81_vm0, %v40_v7  ;;  %68 = vperm.xlu0 %619, %v44_v8   ;;  %v60_v16 = vld [vmem:[%s817_s8] sm:$0xff]  ;;  %v48_v36 = vld [vmem:[%s813_s4 + $0x8] sm:$0xff]  ;;  %v49_v37 = vld [vmem:[%s813_s4 + $0x10] sm:$0xff]  ;;  %s491_s2 = sshll.u32 %s649_s13, 4  ;;  %s492_s2 = int_to_ptr.vmem [resolvable:$true] %s491_s2 }
   0x9   :  { %546 = vmatprep.mubr.msk.f32.mxu0 %vm81_vm0, %v41_v9  ;;  %v47_v17 = vld [vmem:[%s813_s4] sm:$0xff]  ;;  %v50_v38 = vld [vmem:[%s813_s4 + $0x18] sm:$0xff]  ;;  %v36_v40 = vld [vmem:[%s810_s1 + $0x8] sm:$0xff]  ;;  %s621_s14 = scalar_lea.vmem %s492_s2, 128  ;;  %p626_p1 = scmp.lt.s32.totalorder %s492_s2, %s492_s2 }
   0xa   :  { %292 = vperm.xlu1 %620, %v56_v13   ;;  %557 = vmatprep.mubr.msk.f32.mxu1 %vm183_vm1, %v47_v17  ;;  %v51_v39 = vld [vmem:[%s814_s5] sm:$0xff]  ;;  %v38_v46 = vld [vmem:[%s810_s1 + $0x18] sm:$0xff]  ;;  %v37_v48 = vld [vmem:[%s810_s1 + $0x10] sm:$0xff]  ;;  %p622_p0 = scmp.ne.s32.totalorder %s492_s2, %s621_s14  ;;  %p627_p2 = scmp.lt.s32.totalorder %s621_s14, %s621_s14 }
   0xb   :  { %v35_v41 = vld [vmem:[%s810_s1] sm:$0xff]  ;;  %v52_v58 = vld [vmem:[%s814_s5 + $0x8] sm:$0xff]  ;;  %v53_v59 = vld [vmem:[%s814_s5 + $0x10] sm:$0xff] }
   0xc   :  { %547 = vmatmul.mubr.msk.f32.gmra.mrb[2].mxu0 %vm81_vm0, %v42_v11  ;;  %287 = vperm.xlu0 %619, %v55_v12   ;;  %v54_v60 = vld [vmem:[%s814_s5 + $0x18] sm:$0xff]  ;;  %v59_v17 = vld [vmem:[%s816_s7] sm:$0xff]  ;;  %p628_p3 = por %p627_p2, %p626_p1 }
   0xd   :  { %571 = vmatprep.mubr.msk.f32.mxu0 %vm183_vm1, %v51_v39 }
   0xe   :  { %302 = vperm.xlu1 %620, %v58_v15   ;;  %p629_p4 = pnand %p628_p3, %p622_p0 }
  0x10   :  { %297 = vperm.xlu0 %619, %v57_v14  }
  0x14   :  { %408 = vperm.xlu0 %619, %v60_v16  }
  0x81   :  { %v74_v19 = vpop.permute.xlu1 %73 }
  0x83   :  { %v64_v18 = vpop.permute.xlu0 %63 }
  0x85   :  { %v79_v26 = vpop.permute.xlu1 %78 }
  0x87   :  { %v69_v20 = vpop.permute.xlu0 %68 }
  0x89   :  { %v293_v63 = vpop.permute.xlu1 %292 }
  0x8b   :  { %v288_v0 = vpop.permute.xlu0 %287 }
  0x8d   :  { %v303_v6 = vpop.permute.xlu1 %302 }
  0x8f   :  { %v298_v9 = vpop.permute.xlu0 %297 }
  0xdb   :  { %v545_v21 = vpop.f32.mrb[0].mxu0 }
  0xdc   :  { %v166_v22 = vadd.f32 %v545_v21, %v69_v20  ;;  %v160_v23 = vpop.f32.mrb[1].mxu0 }
  0xdd   :  { %v161_v24 = vadd.f32 %v160_v23, %v64_v18  ;;  %v409_v18 = vpop.permute.xlu0 %408 }
  0xde   :  { %v180_v25 = vmax.f32 %v166_v22, 0.0 }
  0xdf   :  { %v179_v27 = vmax.f32 %v161_v24, 0.0  ;;  %v548_v28 = vpop.f32.mrb[2].mxu0 }
  0xe0   :  { %v176_v29 = vadd.f32 %v548_v28, %v79_v26  ;;  %v170_v30 = vpop.f32.mrb[3].mxu0 }
  0xe1   :  { %v171_v31 = vadd.f32 %v170_v30, %v74_v19  ;;  %v592_v32 = vpack.c.bf16 %v180_v25, %v179_v27 }
  0xe2   :  { %v182_v33 = vmax.f32 %v176_v29, 0.0 }
  0xe3   :  { %v181_v34 = vmax.f32 %v171_v31, 0.0  ;;  %593 = vmatprep.subr.bf16.mxu1 %v592_v32 }
  0xe4   :  { %595 = vmatpush3.bf16.msra.mxu1 %v592_v32 }
  0xe5   :  { %v596_v35 = vpack.c.bf16 %v182_v33, %v181_v34 }
  0xe7   :  { %597 = vmatprep.subr.bf16.mxu1 %v596_v35 }
  0xe8   :  { %599 = vmatpush3.bf16.msra.mxu1 %v596_v35 }
  0xe9   :  { %608 = vmatprep.subr.bf16.mxu1 %v646_v61 }
  0xeb   :  { %558 = vmatmul.mubr.msk.f32.vlgmr.msra.gmra.mrb[0].mxu1 %vm183_vm1, %v48_v36 }
  0xec   :  { %560 = vmatprep.mubr.msk.f32.mxu1 %vm183_vm1, %v49_v37 }
  0xef   :  { %561 = vmatmul.mubr.msk.f32.gmra.mrb[2].mxu1 %vm183_vm1, %v50_v38 }
  0xf0   :  { %585 = vmatprep.mubr.msk.f32.mxu1 %vm647_vm2, %v648_v62 }
 0x1be   :  { %v559_v42 = vpop.f32.mrb[0].mxu1 }
 0x1bf   :  { %v268_v43 = vadd.f32 %v559_v42, %v36_v40  ;;  %v262_v44 = vpop.f32.mrb[1].mxu1 }
 0x1c0   :  { %v263_v45 = vadd.f32 %v262_v44, %v35_v41 }
 0x1c1   :  { %v282_v47 = vmax.f32 %v268_v43, 0.0 }
 0x1c2   :  { %v281_v49 = vmax.f32 %v263_v45, 0.0  ;;  %v562_v50 = vpop.f32.mrb[2].mxu1 }
 0x1c3   :  { %v278_v51 = vadd.f32 %v562_v50, %v38_v46  ;;  %v272_v52 = vpop.f32.mrb[3].mxu1 }
 0x1c4   :  { %v600_v53 = vpack.c.bf16 %v282_v47, %v281_v49  ;;  %v273_v54 = vadd.f32 %v272_v52, %v37_v48 }
 0x1c5   :  { %v284_v55 = vmax.f32 %v278_v51, 0.0 }
 0x1c6   :  { %v283_v56 = vmax.f32 %v273_v54, 0.0  ;;  %601 = vmatprep.subr.bf16.mxu0 %v600_v53 }
 0x1c7   :  { %603 = vmatpush3.bf16.msra.mxu0 %v600_v53 }
 0x1c8   :  { %v604_v57 = vpack.c.bf16 %v284_v55, %v283_v56 }
 0x1ca   :  { %605 = vmatprep.subr.bf16.mxu0 %v604_v57 }
 0x1cb   :  { %607 = vmatpush3.bf16.msra.mxu0 %v604_v57 }
 0x1ce   :  { %572 = vmatmul.mubr.msk.f32.vlgmr.msra.gmra.mrb[4].mxu0 %vm183_vm1, %v52_v58 }
 0x1cf   :  { %574 = vmatprep.mubr.msk.f32.mxu0 %vm183_vm1, %v53_v59 }
 0x1d2   :  { %575 = vmatmul.mubr.msk.f32.gmra.mrb[6].mxu0 %vm183_vm1, %v54_v60 }
 0x2a1   :  { %v573_v1 = vpop.f32.mrb[4].mxu0 }
 0x2a2   :  { %v389_v2 = vadd.f32 %v573_v1, %v293_v63  ;;  %v383_v3 = vpop.f32.mrb[5].mxu0 }
 0x2a3   :  { %v384_v4 = vadd.f32 %v383_v3, %v288_v0 }
 0x2a4   :  { %v403_v5 = vmax.f32 %v389_v2, 0.0 }
 0x2a5   :  { %v402_v7 = vmax.f32 %v384_v4, 0.0  ;;  %v576_v8 = vpop.f32.mrb[6].mxu0 }
 0x2a6   :  { %v399_v10 = vadd.f32 %v576_v8, %v303_v6  ;;  %v393_v11 = vpop.f32.mrb[7].mxu0 }
 0x2a7   :  { %v609_v12 = vpack.c.bf16 %v403_v5, %v402_v7  ;;  %v394_v13 = vadd.f32 %v393_v11, %v298_v9 }
 0x2a8   :  { %v405_v14 = vmax.f32 %v399_v10, 0.0 }
 0x2a9   :  { %v404_v15 = vmax.f32 %v394_v13, 0.0  ;;  %610 = vmatpush3.bf16.msra.mxu1 %v609_v12 }
 0x2aa   :  { %611 = vmatprep.subr.bf16.mxu1 %v646_v61 }
 0x2ab   :  { %v612_v16 = vpack.c.bf16 %v405_v14, %v404_v15 }
 0x2ad   :  { %613 = vmatpush3.bf16.msra.mxu1 %v612_v16 }
 0x2b0   :  { %586 = vmatmul.mubr.msk.f32.vlgmr.msra.gmra.mrb[4].mxu1 %vm183_vm1, %v59_v17 }
 0x383   :  { %v480_v19 = vpop.f32.mrb[4].mxu1 }
 0x384   :  { %v481_v20 = vadd.f32 %v480_v19, %v409_v18  ;;  %v587_v21 = vpop.f32.mrb[5].mxu1 }
 0x386   :  { %484 = vst [vmem:[#allocation2] sm:$0xff] %v481_v20 }
 0x387   :  { %632 = shalt.err (!%p629_p4)
}
 0x388   :  { %s633_s7 = scalar_lea.hbm %s818_s9, 128 }
 0x389   :  { %p634_p5 = scmp.ne.s32.totalorder %s818_s9, %s633_s7  ;;  %p637_p6 = scmp.lt.u32.totalorder %s633_s7, %s818_s9 }
 0x38b   :  { %p639_p7 = pnand %p637_p6, %p634_p5 }
 0x38d   :  { %642 = shalt.err (!%p639_p7)
}
 0x38e   :  { %494 = dma.vmem_to_hbm [thread:$0]  %s492_s2, 128, %s818_s9, [#allocation3]  }
 0x38f   :  { %643 = dma.done.wait [#allocation3], 128  }
 0x390   :  { %644 = vsyncadd [#allocation3], 4294967168 }
 0x391   :  { %498 = vsyncpa [#allocation3], 1 }

</bundles_post_ra>
